<compile_context>
chip_gen: v7x
topology: tpu7x:2x2x1
jax: 0.10.0
libtpu: 0.0.40
codegen_flags: <defaults>
</compile_context>

<pallas_src>
import functools

import jax
import jax.numpy as jnp
from jax import lax
from jax.experimental import pallas as pl
from jax.experimental.pallas import tpu as pltpu


def cross_attention_kernel(x_ref, y_ref, wq_ref, wk_ref, wv_ref, o_ref, *,
                           batch, num_queries, num_keys, scale,
                           compute_dtype, approx_recip):
    """Whole problem resident in VMEM, single invocation (no grid).

    x_ref : (B*Nq, Din)   raw f32 query-side input, flattened over batch
    y_ref : (B*Nk, Din)   raw f32 key-side input, flattened over batch
    wq_ref: (Din, Dout)   raw f32 Wq (transposed nn.Linear weight)
    wk_ref: (Din, Dout)   raw f32 Wk
    wv_ref: (Dout, Dout)  raw f32 Wv
    o_ref : (B*Nq, Dout)  output (one contiguous store)
    """
    dout = wq_ref.shape[1]
    bq = batch * num_queries
    bk = batch * num_keys
    cdt = compute_dtype

    # ---- In-kernel weight folding (tiny, one-time) ---------------------------
    #  * fold the 1/sqrt(Dout) softmax scale into Wq (VPU mul),
    #  * fold V = value(key(y)) = (y @ Wk) @ Wv = y @ (Wk @ Wv) (one small MXU push),
    #  * pack [Wq*s | Wk | Wk@Wv] so Q, K and V come from ONE projection matmul.
    wq_s = wq_ref[...] * scale                                            # (Din, Dout) f32
    wkv = jnp.dot(wk_ref[...], wv_ref[...],
                  preferred_element_type=jnp.float32)                     # (Din, Dout) f32
    w_all = jnp.concatenate([wq_s, wk_ref[...], wkv], axis=1).astype(cdt)  # (Din, 3*Dout)

    # ---- Single merged projection matmul for Q, K and V ----------------------
    # Stack query-side and key-side rows along M; the wasted cross products are
    # free (everything is far below one MXU tile) and one RHS load + one
    # push/drain sequence replaces two.
    z = jnp.concatenate([x_ref[...].astype(cdt), y_ref[...].astype(cdt)], axis=0)
    proj = jnp.dot(z, w_all, preferred_element_type=jnp.float32)          # (BQ+BK, 3*Dout)

    q_all = proj[:bq, :dout]              # (BQ, Dout)  pre-scaled queries
    k_all = proj[bq:, dout:2 * dout]      # (BK, Dout)  K = y @ Wk
    v_all = proj[bq:, 2 * dout:]          # (BK, Dout)  V = value(key(y))

    # ---- Batched block-diagonal attention -------------------------------------
    # One scores matmul over all batches at once (contract the Dout axes, no
    # explicit K transpose), with a block-diagonal mask killing cross-batch
    # pairs, then one softmax, one AV matmul and one contiguous store.
    scores = lax.dot_general(q_all.astype(cdt), k_all.astype(cdt),
                             (((1,), (1,)), ((), ())),
                             preferred_element_type=jnp.float32)          # (BQ, BK) f32

    # Block-diagonal mask built from 2-D iota + compares only (no int division);
    # the loop over tiny static B unrolls at trace time into pure VPU filler.
    row = lax.broadcasted_iota(jnp.int32, (bq, bk), 0)
    col = lax.broadcasted_iota(jnp.int32, (bq, bk), 1)
    same_batch = jnp.zeros((bq, bk), dtype=jnp.bool_)
    for b in range(batch):
        in_q = (row >= b * num_queries) & (row < (b + 1) * num_queries)
        in_k = (col >= b * num_keys) & (col < (b + 1) * num_keys)
        same_batch = same_batch | (in_q & in_k)
    scores = jnp.where(same_batch, scores, jnp.float32(-1e30))

    # Numerically stable softmax over keys, kept in f32 (XLU max/sum, EUP exp/recip).
    m = jnp.max(scores, axis=-1, keepdims=True)
    e = jnp.exp(scores - m)
    denom = jnp.sum(e, axis=-1, keepdims=True)
    w = e * pl.reciprocal(denom, approx=approx_recip)                     # (BQ, BK) f32

    out = jnp.dot(w.astype(cdt), v_all.astype(cdt),
                  preferred_element_type=jnp.float32)                     # (BQ, Dout)
    o_ref[...] = out.astype(o_ref.dtype)                                  # single contiguous store


def cross_attention(x, y, wq_t, wk_t, wv_t, *,
                    compute_dtype=jnp.bfloat16, approx_recip=True):
    """CrossAttention forward matching the PyTorch module.

    x: (B, Nq, Din); y: (B, Nk, Din); w*_t: (Din, Dout) transposed nn.Linear
    weights (no bias).  Returns (B, Nq, Dout) in x.dtype.
    """
    B, Nq, Din = x.shape
    _, Nk, Din_y = y.shape
    Dout = wq_t.shape[1]
    assert Din == Din_y
    # V = value(key(y)) (module overwrites y) requires Din == Dout.
    assert wk_t.shape == (Din, Dout) and wv_t.shape == (Dout, Dout)

    scale = 1.0 / (float(Dout) ** 0.5)

    # Only free leading-dim reshapes (bitcasts) here; every cast / scale /
    # weight fold / pack happens inside the kernel, so no extra XLA ops or HBM
    # intermediates surround the call.
    x2 = x.reshape(B * Nq, Din)
    y2 = y.reshape(B * Nk, Din)

    kernel = functools.partial(
        cross_attention_kernel,
        batch=B, num_queries=Nq, num_keys=Nk, scale=scale,
        compute_dtype=compute_dtype, approx_recip=approx_recip)

    # Advisory cost hint for XLA's scheduler around the custom call.
    flops = (2 * Din * Dout * Dout                       # Wk @ Wv fold
             + 2 * (B * Nq + B * Nk) * Din * (3 * Dout)  # merged projection
             + 4 * (B * Nq) * (B * Nk) * Dout)           # scores + AV
    bytes_accessed = 4 * (B * Nq * Din + B * Nk * Din + 2 * Din * Dout
                          + Dout * Dout + B * Nq * Dout)

    vmem = pl.BlockSpec(memory_space=pltpu.MemorySpace.VMEM)
    out = pl.pallas_call(
        kernel,
        out_shape=jax.ShapeDtypeStruct((B * Nq, Dout), x.dtype),
        in_specs=[vmem, vmem, vmem, vmem, vmem],
        out_specs=vmem,
        cost_estimate=pl.CostEstimate(flops=flops,
                                      transcendentals=(B * Nq) * (B * Nk),
                                      bytes_accessed=bytes_accessed),
    )(x2, y2, wq_t, wk_t, wv_t)
    return out.reshape(B, Nq, Dout)


def reference(x, y, wq_t, wk_t, wv_t):
    # Pure-JAX f32 reference of the exact PyTorch forward.
    q = jnp.einsum("bqd,de->bqe", x, wq_t)
    k = jnp.einsum("bkd,de->bke", y, wk_t)
    v = jnp.einsum("bke,ef->bkf", k, wv_t)          # V = value(key(y))
    dout = wq_t.shape[1]
    s = jnp.einsum("bqe,bke->bqk", q, k) / (dout ** 0.5)
    w = jax.nn.softmax(s, axis=-1)
    return jnp.einsum("bqk,bkf->bqf", w, v)


if __name__ == "__main__":
    # Small, module-consistent shapes: in_dim == out_dim == 32 (required by the
    # value(key(y)) composition in the original forward).
    B, Nq, Nk, D = 2, 8, 16, 32

    key = jax.random.PRNGKey(0)
    kx, ky, k1, k2, k3 = jax.random.split(key, 5)
    x = jax.random.normal(kx, (B, Nq, D), dtype=jnp.float32)
    y = jax.random.normal(ky, (B, Nk, D), dtype=jnp.float32)

    # Deterministic "Linear" weights, stored already transposed: (D_in, D_out).
    bound = 1.0 / (D ** 0.5)
    wq_t = jax.random.uniform(k1, (D, D), jnp.float32, -bound, bound)
    wk_t = jax.random.uniform(k2, (D, D), jnp.float32, -bound, bound)
    wv_t = jax.random.uniform(k3, (D, D), jnp.float32, -bound, bound)

    ref = reference(x, y, wq_t, wk_t, wv_t)

    # Fast path (recommended): bf16 MXU inputs, f32 accumulation, approx recip.
    out_fast = jax.block_until_ready(
        cross_attention(x, y, wq_t, wk_t, wv_t,
                        compute_dtype=jnp.bfloat16, approx_recip=True))
    assert out_fast.shape == (B, Nq, D), out_fast.shape
    assert jnp.allclose(out_fast, ref, atol=5e-2, rtol=5e-2), \
        float(jnp.max(jnp.abs(out_fast - ref)))

    # Full-f32 / exact-reciprocal path for tight numerical validation.
    out_f32 = jax.block_until_ready(
        cross_attention(x, y, wq_t, wk_t, wv_t,
                        compute_dtype=jnp.float32, approx_recip=False))
    assert jnp.allclose(out_f32, ref, atol=1e-4, rtol=1e-4), \
        float(jnp.max(jnp.abs(out_f32 - ref)))

    print("KERNEL_OK")
</pallas_src>

<mosaic_0001>
module attributes {stable_mosaic.version = 11 : i64} {
  func.func @cross_attention_kernel(%arg0: memref<16x32xf32, #tpu.memory_space<vmem>>, %arg1: memref<32x32xf32, #tpu.memory_space<vmem>>, %arg2: memref<32x32xf32, #tpu.memory_space<vmem>>, %arg3: memref<32x32xf32, #tpu.memory_space<vmem>>, %arg4: memref<32x32xf32, #tpu.memory_space<vmem>>, %arg5: memref<16x32xf32, #tpu.memory_space<vmem>>) attributes {dimension_semantics = [], scalar_prefetch = 0 : i64, scratch_operands = 0 : i64, tpu.core_type = #tpu.core_type<tc>} {
    %c0 = arith.constant 0 : index
    %c0_0 = arith.constant 0 : index
    %0 = vector.load %arg2[%c0, %c0_0] : memref<32x32xf32, #tpu.memory_space<vmem>>, vector<32x32xf32>
    %cst = arith.constant 0.176776692 : f32
    %1 = vector.broadcast %cst : f32 to vector<32x32xf32>
    %2 = arith.mulf %0, %1 : vector<32x32xf32>
    %c0_1 = arith.constant 0 : index
    %c0_2 = arith.constant 0 : index
    %3 = vector.load %arg3[%c0_1, %c0_2] : memref<32x32xf32, #tpu.memory_space<vmem>>, vector<32x32xf32>
    %c0_3 = arith.constant 0 : index
    %c0_4 = arith.constant 0 : index
    %4 = vector.load %arg4[%c0_3, %c0_4] : memref<32x32xf32, #tpu.memory_space<vmem>>, vector<32x32xf32>
    %cst_5 = arith.constant dense<0.000000e+00> : vector<32x32xf32>
    %5 = tpu.matmul %3, %4, %cst_5 {dimension_numbers = #tpu.dot_dimension_numbers<[1], [0], [0], [1], [0, 0, 1, 1], [], []>} : vector<32x32xf32>, vector<32x32xf32>, vector<32x32xf32> -> vector<32x32xf32>
    %c0_6 = arith.constant 0 : index
    %c0_7 = arith.constant 0 : index
    %6 = vector.load %arg3[%c0_6, %c0_7] : memref<32x32xf32, #tpu.memory_space<vmem>>, vector<32x32xf32>
    %7 = tpu.concatenate %2, %6, %5 in 1 : vector<32x32xf32>, vector<32x32xf32>, vector<32x32xf32> -> vector<32x96xf32>
    %8 = arith.truncf %7 : vector<32x96xf32> to vector<32x96xbf16>
    %c0_8 = arith.constant 0 : index
    %c0_9 = arith.constant 0 : index
    %9 = vector.load %arg0[%c0_8, %c0_9] : memref<16x32xf32, #tpu.memory_space<vmem>>, vector<16x32xf32>
    %10 = arith.truncf %9 : vector<16x32xf32> to vector<16x32xbf16>
    %c0_10 = arith.constant 0 : index
    %c0_11 = arith.constant 0 : index
    %11 = vector.load %arg1[%c0_10, %c0_11] : memref<32x32xf32, #tpu.memory_space<vmem>>, vector<32x32xf32>
    %12 = arith.truncf %11 : vector<32x32xf32> to vector<32x32xbf16>
    %13 = tpu.concatenate %10, %12 in 0 : vector<16x32xbf16>, vector<32x32xbf16> -> vector<48x32xbf16>
    %cst_12 = arith.constant dense<0.000000e+00> : vector<48x96xf32>
    %14 = tpu.matmul %13, %8, %cst_12 {dimension_numbers = #tpu.dot_dimension_numbers<[1], [0], [0], [1], [0, 0, 1, 1], [], []>} : vector<48x32xbf16>, vector<32x96xbf16>, vector<48x96xf32> -> vector<48x96xf32>
    %15 = vector.extract_strided_slice %14 {offsets = [0, 0], sizes = [16, 32], strides = [1, 1]} : vector<48x96xf32> to vector<16x32xf32>
    %16 = vector.extract_strided_slice %14 {offsets = [16, 32], sizes = [32, 32], strides = [1, 1]} : vector<48x96xf32> to vector<32x32xf32>
    %17 = vector.extract_strided_slice %14 {offsets = [16, 64], sizes = [32, 32], strides = [1, 1]} : vector<48x96xf32> to vector<32x32xf32>
    %18 = arith.truncf %15 : vector<16x32xf32> to vector<16x32xbf16>
    %19 = arith.truncf %16 : vector<32x32xf32> to vector<32x32xbf16>
    %cst_13 = arith.constant dense<0.000000e+00> : vector<16x32xf32>
    %20 = tpu.matmul %18, %19, %cst_13 {dimension_numbers = #tpu.dot_dimension_numbers<[1], [1], [0], [0], [0, 0, 1, 0], [], []>} : vector<16x32xbf16>, vector<32x32xbf16>, vector<16x32xf32> -> vector<16x32xf32>
    %21 = tpu.iota {dimensions = array<i32: 0>} : vector<16x32xi32>
    %22 = tpu.iota {dimensions = array<i32: 1>} : vector<16x32xi32>
    %false = arith.constant false
    %23 = vector.broadcast %false : i1 to vector<16x32xi1>
    %c0_i32 = arith.constant 0 : i32
    %24 = vector.broadcast %c0_i32 : i32 to vector<16x32xi32>
    %25 = arith.cmpi sge, %21, %24 : vector<16x32xi32>
    %c8_i32 = arith.constant 8 : i32
    %26 = vector.broadcast %c8_i32 : i32 to vector<16x32xi32>
    %27 = arith.cmpi slt, %21, %26 : vector<16x32xi32>
    %28 = arith.andi %25, %27 : vector<16x32xi1>
    %c0_i32_14 = arith.constant 0 : i32
    %29 = vector.broadcast %c0_i32_14 : i32 to vector<16x32xi32>
    %30 = arith.cmpi sge, %22, %29 : vector<16x32xi32>
    %c16_i32 = arith.constant 16 : i32
    %31 = vector.broadcast %c16_i32 : i32 to vector<16x32xi32>
    %32 = arith.cmpi slt, %22, %31 : vector<16x32xi32>
    %33 = arith.andi %30, %32 : vector<16x32xi1>
    %34 = arith.andi %28, %33 : vector<16x32xi1>
    %35 = arith.ori %23, %34 : vector<16x32xi1>
    %c8_i32_15 = arith.constant 8 : i32
    %36 = vector.broadcast %c8_i32_15 : i32 to vector<16x32xi32>
    %37 = arith.cmpi sge, %21, %36 : vector<16x32xi32>
    %c16_i32_16 = arith.constant 16 : i32
    %38 = vector.broadcast %c16_i32_16 : i32 to vector<16x32xi32>
    %39 = arith.cmpi slt, %21, %38 : vector<16x32xi32>
    %40 = arith.andi %37, %39 : vector<16x32xi1>
    %c16_i32_17 = arith.constant 16 : i32
    %41 = vector.broadcast %c16_i32_17 : i32 to vector<16x32xi32>
    %42 = arith.cmpi sge, %22, %41 : vector<16x32xi32>
    %c32_i32 = arith.constant 32 : i32
    %43 = vector.broadcast %c32_i32 : i32 to vector<16x32xi32>
    %44 = arith.cmpi slt, %22, %43 : vector<16x32xi32>
    %45 = arith.andi %42, %44 : vector<16x32xi1>
    %46 = arith.andi %40, %45 : vector<16x32xi1>
    %47 = arith.ori %35, %46 : vector<16x32xi1>
    %cst_18 = arith.constant -1.000000e+30 : f32
    %48 = vector.broadcast %cst_18 : f32 to vector<16x32xf32>
    %49 = arith.select %47, %20, %48 : vector<16x32xi1>, vector<16x32xf32>
    %cst_19 = arith.constant dense<0xFF800000> : vector<16xf32>
    %50 = vector.multi_reduction <maximumf>, %49, %cst_19 [1] : vector<16x32xf32> to vector<16xf32>
    %51 = vector.shape_cast %50 : vector<16xf32> to vector<16x1xf32>
    %52 = vector.broadcast %51 : vector<16x1xf32> to vector<16x32xf32>
    %53 = arith.subf %49, %52 : vector<16x32xf32>
    %54 = math.exp %53 : vector<16x32xf32>
    %cst_20 = arith.constant dense<0.000000e+00> : vector<16xf32>
    %55 = vector.multi_reduction <add>, %54, %cst_20 [1] : vector<16x32xf32> to vector<16xf32>
    %56 = vector.shape_cast %55 : vector<16xf32> to vector<16x1xf32>
    %57 = tpu.reciprocal %56 {approx = true} : vector<16x1xf32> -> vector<16x1xf32>
    %58 = vector.broadcast %57 : vector<16x1xf32> to vector<16x32xf32>
    %59 = arith.mulf %54, %58 : vector<16x32xf32>
    %60 = arith.truncf %59 : vector<16x32xf32> to vector<16x32xbf16>
    %61 = arith.truncf %17 : vector<32x32xf32> to vector<32x32xbf16>
    %cst_21 = arith.constant dense<0.000000e+00> : vector<16x32xf32>
    %62 = tpu.matmul %60, %61, %cst_21 {dimension_numbers = #tpu.dot_dimension_numbers<[1], [0], [0], [1], [0, 0, 1, 1], [], []>} : vector<16x32xbf16>, vector<32x32xbf16>, vector<16x32xf32> -> vector<16x32xf32>
    %c0_22 = arith.constant 0 : index
    %c0_23 = arith.constant 0 : index
    %63 = vector.load %arg5[%c0_22, %c0_23] : memref<16x32xf32, #tpu.memory_space<vmem>>, vector<16x32xf32>
    tpu.vector_store %arg5[%c0_22, %c0_23], %62 {strides = array<i32>} : memref<16x32xf32, #tpu.memory_space<vmem>>, vector<16x32xf32>,
    return
  }
}

</mosaic_0001>

<bundles_post_ra>
// kernel: tpu_custom_call.1
= control target key start
LH: loop header
LB: loop body
LE: loop exit
PB: predicated region body
PF: predicated region fallthrough
CT: control target
= control target key end

     0   :  { %10 = vsyncpa [#allocation3], 0  ;;  %s957_s0 = inlined_call_operand.hbm [shape: f32[16,32], index: 0, kind: input, shape index: {}]   ;;  %s958_s1 = inlined_call_operand.hbm [shape: f32[32,32], index: 1, kind: input, shape index: {}]   ;;  %s959_s2 = inlined_call_operand.hbm [shape: f32[32,32], index: 2, kind: input, shape index: {}]   ;;  %s960_s3 = inlined_call_operand.hbm [shape: f32[32,32], index: 3, kind: input, shape index: {}]   ;;  %s961_s4 = inlined_call_operand.hbm [shape: f32[32,32], index: 4, kind: input, shape index: {}]   ;;  %s962_s5 = inlined_call_operand.hbm [shape: f32[16,32], index: 5, kind: output, shape index: {}]  }
   0x1   :  { %11 = vsyncpa [#allocation6], 0 }
   0x2   :  { %12 = vsyncpa [#allocation9], 0 }
   0x3   :  { %13 = vsyncpa [#allocation4], 0  ;;  %s765_s18 = smov [#allocation5]   ;;  %s766_s20 = smov [#allocation8]  }
   0x4   :  { %s31_s19 = sshll.u32 %s765_s18, 4  ;;  %s55_s21 = sshll.u32 %s766_s20, 4  ;;  %s32_s19 = int_to_ptr.vmem [resolvable:$true] %s31_s19  ;;  %s808_s21 = int_to_ptr.vmem [resolvable:$true] %s55_s21 }
   0x5   :  { %s625_s24 = scalar_lea.hbm %s958_s1, 512 }
   0x6   :  { %p626_p0 = scmp.ne.s32.totalorder %s958_s1, %s625_s24  ;;  %p629_p1 = scmp.lt.u32.totalorder %s625_s24, %s958_s1 }
   0x8   :  { %p631_p2 = pnand %p629_p1, %p626_p0 }
   0xa   :  { %634 = shalt.err (!%p631_p2)
}
   0xb   :  { %s635_s29 = scalar_lea.vmem %s32_s19, 512  ;;  %p640_p4 = scmp.lt.s32.totalorder %s32_s19, %s32_s19 }
   0xc   :  { %p636_p3 = scmp.ne.s32.totalorder %s32_s19, %s635_s29  ;;  %p641_p5 = scmp.lt.s32.totalorder %s635_s29, %s635_s29 }
   0xe   :  { %p642_p6 = por %p641_p5, %p640_p4 }
  0x10   :  { %p643_p7 = pnand %p642_p6, %p636_p3 }
  0x12   :  { %646 = shalt.err (!%p643_p7)
}
  0x13   :  { %s767_s30 = smov 128   ;;  %s768_s6 = smov 8  }
  0x14   :  { %37 = dma.hbm_to_vmem [thread:$0]  %s958_s1, 512, %s32_s19, [#allocation6], %s767_s30, %s767_s30, %s768_s6  }
  0x15   :  { %s647_s11 = scalar_lea.hbm %s960_s3, 512 }
  0x16   :  { %p648_p8 = scmp.ne.s32.totalorder %s960_s3, %s647_s11  ;;  %p651_p9 = scmp.lt.u32.totalorder %s647_s11, %s960_s3 }
  0x18   :  { %p653_p10 = pnand %p651_p9, %p648_p8 }
  0x1a   :  { %656 = shalt.err (!%p653_p10)
}
  0x1b   :  { %s657_s16 = scalar_lea.vmem %s808_s21, 512  ;;  %p662_p12 = scmp.lt.s32.totalorder %s808_s21, %s808_s21 }
  0x1c   :  { %p658_p11 = scmp.ne.s32.totalorder %s808_s21, %s657_s16  ;;  %p663_p13 = scmp.lt.s32.totalorder %s657_s16, %s657_s16 }
  0x1e   :  { %p664_p0 = por %p663_p13, %p662_p12 }
  0x20   :  { %p665_p1 = pnand %p664_p0, %p658_p11 }
  0x22   :  { %668 = shalt.err (!%p665_p1)
}
  0x23   :  { %61 = dma.hbm_to_vmem [thread:$0]  %s960_s3, 512, %s808_s21, [#allocation9], %s767_s30, %s767_s30, %s768_s6  }
  0x24   :  { %s769_s18 = smov [#allocation2]   ;;  %s770_s20 = smov [#allocation7]  }
  0x25   :  { %s19_s19 = sshll.u32 %s769_s18, 4  ;;  %s43_s22 = sshll.u32 %s770_s20, 4  ;;  %s20_s19 = int_to_ptr.vmem [resolvable:$true] %s19_s19  ;;  %s845_s22 = int_to_ptr.vmem [resolvable:$true] %s43_s22 }
  0x26   :  { %s669_s25 = scalar_lea.hbm %s957_s0, 256 }
  0x27   :  { %p670_p2 = scmp.ne.s32.totalorder %s957_s0, %s669_s25  ;;  %p673_p3 = scmp.lt.u32.totalorder %s669_s25, %s957_s0 }
  0x29   :  { %p675_p4 = pnand %p673_p3, %p670_p2 }
  0x2b   :  { %678 = shalt.err (!%p675_p4)
}
  0x2c   :  { %s679_s3 = scalar_lea.vmem %s20_s19, 256  ;;  %p684_p6 = scmp.lt.s32.totalorder %s20_s19, %s20_s19 }
  0x2d   :  { %p680_p5 = scmp.ne.s32.totalorder %s20_s19, %s679_s3  ;;  %p685_p7 = scmp.lt.s32.totalorder %s679_s3, %s679_s3 }
  0x2f   :  { %p686_p8 = por %p685_p7, %p684_p6 }
  0x31   :  { %p687_p9 = pnand %p686_p8, %p680_p5 }
  0x33   :  { %690 = shalt.err (!%p687_p9)
}
  0x34   :  { %25 = dma.hbm_to_vmem [thread:$0]  %s957_s0, 256, %s20_s19, [#allocation3], %s767_s30, %s767_s30, %s768_s6  }
  0x35   :  { %s691_s10 = scalar_lea.hbm %s959_s2, 512 }
  0x36   :  { %p692_p10 = scmp.ne.s32.totalorder %s959_s2, %s691_s10  ;;  %p695_p11 = scmp.lt.u32.totalorder %s691_s10, %s959_s2 }
  0x38   :  { %p697_p12 = pnand %p695_p11, %p692_p10 }
  0x3a   :  { %700 = shalt.err (!%p697_p12)
}
  0x3b   :  { %s701_s15 = scalar_lea.vmem %s845_s22, 512  ;;  %p706_p0 = scmp.lt.s32.totalorder %s845_s22, %s845_s22 }
  0x3c   :  { %p702_p13 = scmp.ne.s32.totalorder %s845_s22, %s701_s15  ;;  %p707_p1 = scmp.lt.s32.totalorder %s701_s15, %s701_s15 }
  0x3e   :  { %p708_p2 = por %p707_p1, %p706_p0 }
  0x40   :  { %p709_p3 = pnand %p708_p2, %p702_p13 }
  0x42   :  { %712 = shalt.err (!%p709_p3)
}
  0x43   :  { %49 = dma.hbm_to_vmem [thread:$0]  %s959_s2, 512, %s845_s22, [#allocation6], %s767_s30, %s767_s30, %s768_s6  }
  0x44   :  { %s771_s1 = smov [#allocation10]   ;;  %s713_s20 = scalar_lea.hbm %s961_s4, 512 }
  0x45   :  { %s67_s17 = sshll.u32 %s771_s1, 4  ;;  %p714_p4 = scmp.ne.s32.totalorder %s961_s4, %s713_s20  ;;  %s68_s17 = int_to_ptr.vmem [resolvable:$true] %s67_s17 }
  0x46   :  { %p717_p5 = scmp.lt.u32.totalorder %s713_s20, %s961_s4 }
  0x48   :  { %p719_p6 = pnand %p717_p5, %p714_p4 }
  0x4a   :  { %722 = shalt.err (!%p719_p6)
}
  0x4b   :  { %s723_s27 = scalar_lea.vmem %s68_s17, 512  ;;  %p728_p8 = scmp.lt.s32.totalorder %s68_s17, %s68_s17 }
  0x4c   :  { %p724_p7 = scmp.ne.s32.totalorder %s68_s17, %s723_s27  ;;  %p729_p9 = scmp.lt.s32.totalorder %s723_s27, %s723_s27 }
  0x4e   :  { %p730_p10 = por %p729_p9, %p728_p8 }
  0x50   :  { %p731_p11 = pnand %p730_p10, %p724_p7 }
  0x52   :  { %734 = shalt.err (!%p731_p11)
}
  0x53   :  { %73 = dma.hbm_to_vmem [thread:$0]  %s961_s4, 512, %s68_s17, [#allocation9], %s767_s30, %s767_s30, %s768_s6  }
  0x54   :  { %757 = dma.done.wait [#allocation3], 256  }
  0x55   :  { %758 = vsyncadd [#allocation3], 4294967040 }
  0x56   :  { %759 = dma.done.wait [#allocation6], 1024  }
  0x57   :  { %760 = vsyncadd [#allocation6], 4294966272 }
  0x58   :  { %761 = dma.done.wait [#allocation9], 1024  }
  0x59   :  { %762 = vsyncadd [#allocation9], 4294966272  ;;  %vm106_vm0 = vcmask 261120   ;;  %v102_v0 = vld [vmem:[#allocation10] sm:$0xff]  ;;  %v103_v1 = vld [vmem:[#allocation10 + $0x8] sm:$0xff]  ;;  %s772_s4 = smov 32  }
  0x5a   :  { %v104_v2 = vld [vmem:[#allocation10 + $0x10] sm:$0xff]  ;;  %v576_v3 = vpack.c.bf16 %v103_v1, %v102_v0  ;;  %v105_v4 = vld [vmem:[#allocation10 + $0x18] sm:$0xff]  ;;  %v98_v5 = vld [vmem:[#allocation8] sm:$0xff]  ;;  %v773_v12 = vmov 0.0   ;;  %vm774_vm1 = vmmov 0   ;;  %s775_s28 = smov 64  }
  0x5b   :  { %v99_v6 = vld [vmem:[#allocation8 + $0x8] sm:$0xff]  ;;  %v580_v7 = vpack.c.bf16 %v105_v4, %v104_v2  ;;  %538 = vmatprep.mubr.msk.f32.mxu0 %vm106_vm0, %v98_v5  ;;  %v100_v9 = vld [vmem:[#allocation8 + $0x10] sm:$0xff]  ;;  %v101_v10 = vld [vmem:[#allocation8 + $0x18] sm:$0xff]  ;;  %544 = vmatprep.subr.bf16.mxu1 %v773_v12  ;;  %vm236_vm2 = vcmask 523264   ;;  %s776_s29 = smov 96   ;;  %s777_s3 = smov [#allocation11]  }
  0x5c   :  { %v597_v8 = vpack.i.bf16 %v99_v6, %v98_v5  ;;  %577 = vmatprep.subr.bf16.mxu0 %v576_v3  ;;  %v607_v11 = vpack.i.bf16 %v101_v10, %v100_v9  ;;  %548 = vmatprep.mubr.msk.bf16.mxu1 %vm774_vm1, %v773_v12  ;;  %v90_v20 = vld [vmem:[#allocation7] sm:$0xff]  ;;  %v91_v21 = vld [vmem:[#allocation7 + $0x8] sm:$0xff]  ;;  %v92_v25 = vld [vmem:[#allocation7 + $0x10] sm:$0xff]  ;;  %s488_s21 = sshll.u32 %s777_s3, 4  ;;  %s489_s21 = int_to_ptr.vmem [resolvable:$true] %s488_s21 }
  0x5d   :  { %579 = vmatpush3.bf16.msra.mxu0 %v576_v3  ;;  %v93_v26 = vld [vmem:[#allocation7 + $0x18] sm:$0xff]  ;;  %v94_v27 = vmul.f32 0.17677669, %v90_v20  ;;  %v95_v28 = vmul.f32 0.17677669, %v91_v21  ;;  %v243_v46 = vld [vmem:[#allocation2] sm:$0xff]  ;;  %p740_p13 = scmp.lt.s32.totalorder %s489_s21, %s489_s21 }
  0x5e   :  { %598 = vrot.lane.b32.xlu0 %v597_v8, %s772_s4  ;;  %581 = vmatprep.subr.bf16.mxu0 %v580_v7  ;;  %v96_v30 = vmul.f32 0.17677669, %v92_v25  ;;  %v97_v31 = vmul.f32 0.17677669, %v93_v26  ;;  %v244_v47 = vld [vmem:[#allocation2 + $0x8] sm:$0xff]  ;;  %v246_v52 = vld [vmem:[#allocation5] sm:$0xff] }
  0x5f   :  { %608 = vrot.lane.b32.xlu1 %v607_v11, %s772_s4  ;;  %v245_v51 = vpack.c.bf16 %v244_v47, %v243_v46  ;;  %v247_v53 = vld [vmem:[#allocation5 + $0x8] sm:$0xff]  ;;  %v248_v55 = vld [vmem:[#allocation5 + $0x10] sm:$0xff]  ;;  %v249_v56 = vld [vmem:[#allocation5 + $0x18] sm:$0xff]  ;;  %s735_s7 = scalar_lea.vmem %s489_s21, 256 }
  0x60   :  { %v250_v54 = vpack.c.bf16 %v247_v53, %v246_v52  ;;  %v251_v57 = vpack.c.bf16 %v249_v56, %v248_v55  ;;  %p736_p12 = scmp.ne.s32.totalorder %s489_s21, %s735_s7  ;;  %p741_p0 = scmp.lt.s32.totalorder %s735_s7, %s735_s7 }
  0x61   :  { %583 = vmatpush3.bf16.msra.mxu0 %v580_v7 }
  0x62   :  { %560 = vmatprep.subr.bf16.mxu0 %v773_v12  ;;  %p742_p1 = por %p741_p0, %p740_p13 }
  0x64   :  { %539 = vmatmul.mubr.msk.f32.vlgmr.msra.gmra.mrb[0].mxu0 %vm106_vm0, %v99_v6  ;;  %p743_p2 = pnand %p742_p1, %p736_p12 }
  0x65   :  { %541 = vmatprep.mubr.msk.f32.mxu0 %vm106_vm0, %v100_v9 }
  0x68   :  { %542 = vmatmul.mubr.msk.f32.gmra.mrb[2].mxu0 %vm106_vm0, %v101_v10 }
  0x69   :  { %564 = vmatprep.mubr.msk.bf16.mxu0 %vm774_vm1, %v773_v12 }
  0xd0   :  { %v599_v19 = vpop.permute.xlu0 %598 }
  0xd1   :  { %v601_v22 = vunpack.i.h.bf16 %v599_v19  ;;  %v600_v23 = vunpack.i.l.bf16 %v599_v19  ;;  %v609_v24 = vpop.permute.xlu1 %608 }
  0xd2   :  { %v611_v34 = vunpack.i.h.bf16 %v609_v24  ;;  %v610_v35 = vunpack.i.l.bf16 %v609_v24 }
  0xd3   :  { %v232_v36 = vsel %vm106_vm0, %v94_v27, %v600_v23  ;;  %v233_v37 = vsel %vm106_vm0, %v95_v28, %v601_v22 }
  0xd4   :  { %v234_v44 = vsel %vm106_vm0, %v96_v30, %v610_v35  ;;  %v235_v45 = vsel %vm106_vm0, %v97_v31, %v611_v34 }
 0x137   :  { %v540_v13 = vpop.f32.mrb[0].mxu0 }
 0x138   :  { %v185_v14 = vpop.f32.mrb[1].mxu0 }
 0x139   :  { %v602_v15 = vpack.i.bf16 %v540_v13, %v185_v14  ;;  %v380_v14 = vlaneseq }
 0x13b   :  { %603 = vrot.lane.b32.xlu0 %v602_v15, %s775_s28  ;;  %v543_v16 = vpop.f32.mrb[2].mxu0  ;;  %v381_v15 = vand.u32 127, %v380_v14 }
 0x13c   :  { %v195_v17 = vpop.f32.mrb[3].mxu0 }
 0x13d   :  { %v612_v18 = vpack.i.bf16 %v543_v16, %v195_v17  ;;  %vm399_vm3 = vcmp.ge.s32.totalorder %v381_v15, 16  ;;  %vm400_vm4 = vcmp.lt.s32.totalorder %v381_v15, 32  ;;  %vm389_vm5 = vcmp.lt.s32.totalorder %v381_v15, 16 }
 0x13e   :  { %vm401_vm6 = vmand %vm399_vm3, %vm400_vm4 }
 0x13f   :  { %613 = vrot.lane.b32.xlu1 %v612_v18, %s775_s28 }
 0x1ad   :  { %v604_v29 = vpop.permute.xlu0 %603 }
 0x1ae   :  { %v606_v32 = vunpack.i.h.bf16 %v604_v29  ;;  %v605_v33 = vunpack.i.l.bf16 %v604_v29 }
 0x1b0   :  { %v237_v38 = vsel %vm236_vm2, %v232_v36, %v605_v33  ;;  %v238_v39 = vsel %vm236_vm2, %v233_v37, %v606_v32 }
 0x1b1   :  { %v614_v40 = vpop.permute.xlu1 %613  ;;  %v241_v41 = vpack.c.bf16 %v238_v39, %v237_v38 }
 0x1b2   :  { %v616_v42 = vunpack.i.h.bf16 %v614_v40  ;;  %v615_v43 = vunpack.i.l.bf16 %v614_v40 }
 0x1b3   :  { %545 = vmatpush3.bf16.msra.mxu1 %v241_v41 }
 0x1b4   :  { %546 = vmatprep.subr.bf16.mxu1 %v773_v12  ;;  %v239_v48 = vsel %vm236_vm2, %v234_v44, %v615_v43  ;;  %v240_v49 = vsel %vm236_vm2, %v235_v45, %v616_v42 }
 0x1b5   :  { %v242_v50 = vpack.c.bf16 %v240_v49, %v239_v48 }
 0x1b7   :  { %547 = vmatpush3.bf16.msra.mxu1 %v242_v50 }
 0x1ba   :  { %549 = vmatmul.mubr.msk.bf16.vlgmr.msra.gmra.mrb[0].mxu1 %vm106_vm0, %v245_v51 }
 0x1bb   :  { %552 = vmatprep.mubr.msk.bf16.mxu1 %vm774_vm1, %v773_v12 }
 0x1c2   :  { %553 = vmatmul.mubr.msk.bf16.gmra.mrb[4].mxu1 %vm106_vm0, %v250_v54 }
 0x1c3   :  { %556 = vmatprep.mubr.msk.bf16.mxu1 %vm774_vm1, %v773_v12 }
 0x1ca   :  { %557 = vmatmul.mubr.msk.bf16.gmra.mrb[8].mxu1 %vm106_vm0, %v251_v57 }
 0x28d   :  { %v295_v58 = vpop.f32.mrb[0].mxu1 }
 0x28e   :  { %v550_v59 = vpop.f32.mrb[1].mxu1 }
 0x28f   :  { %v298_v60 = vpop.f32.mrb[2].mxu1 }
 0x290   :  { %v318_v61 = vpack.c.bf16 %v298_v60, %v295_v58  ;;  %v551_v62 = vpop.f32.mrb[3].mxu1 }
 0x295   :  { %v303_v63 = vpop.f32.mrb[4].mxu1 }
 0x296   :  { %v554_v0 = vpop.f32.mrb[5].mxu1 }
 0x297   :  { %v306_v1 = vpop.f32.mrb[6].mxu1 }
 0x298   :  { %v319_v2 = vpack.c.bf16 %v306_v1, %v303_v63  ;;  %v555_v3 = vpop.f32.mrb[7].mxu1 }
 0x29a   :  { %323 = vrot.lane.b32.xlu0 %v319_v2, %s776_s29 }
 0x29d   :  { %v311_v4 = vpop.f32.mrb[8].mxu1 }
 0x29e   :  { %v558_v5 = vpop.f32.mrb[9].mxu1 }
 0x29f   :  { %v314_v6 = vpop.f32.mrb[10].mxu1 }
 0x2a0   :  { %v320_v7 = vpack.c.bf16 %v314_v6, %v311_v4  ;;  %v559_v8 = vpop.f32.mrb[11].mxu1 }
 0x2a2   :  { %325 = vrot.lane.b32.xlu1 %v320_v7, %s776_s29 }
 0x30c   :  { %v324_v9 = vpop.permute.xlu0 %323 }
 0x30d   :  { %v331_v10 = vsel %vm106_vm0, %v324_v9, 0 }
 0x30e   :  { %561 = vmatpush3.bf16.xpose.msra.mxu0 %v331_v10 }
 0x30f   :  { %562 = vmatprep.subr.bf16.mxu0 %v773_v12 }
 0x314   :  { %v326_v11 = vpop.permute.xlu1 %325 }
 0x315   :  { %v334_v13 = vsel %vm106_vm0, %v326_v11, 0 }
 0x316   :  { %563 = vmatpush3.bf16.xpose.msra.mxu0 %v334_v13 }
 0x317   :  { %568 = vmatprep.subr.bf16.mxu0 %v773_v12 }
 0x31d   :  { %565 = vmatmul.mubr.msk.bf16.vlgmr.msra.gmra.mrb[4].mxu0 %vm106_vm0, %v318_v61 }
 0x31e   :  { %572 = vmatprep.mubr.msk.bf16.mxu0 %vm774_vm1, %v773_v12 }
 0x3f0   :  { %v370_v16 = vpop.f32.mrb[4].mxu0 }
 0x3f1   :  { %v406_v17 = vsel %vm389_vm5, %v370_v16, -1e+30  ;;  %v566_v18 = vpop.f32.mrb[5].mxu0 }
 0x3f2   :  { %v373_v19 = vpop.f32.mrb[6].mxu0  ;;  %v408_v20 = vsel %vm106_vm0, %v406_v17, -inf }
 0x3f3   :  { %v407_v21 = vsel %vm401_vm6, %v373_v19, -1e+30  ;;  %409 = vmax.xlane.f32.xlu0 %v408_v20  ;;  %v567_v22 = vpop.f32.mrb[7].mxu0 }
 0x3f4   :  { %v411_v23 = vsel %vm106_vm0, %v407_v21, -inf }
 0x3f5   :  { %412 = vmax.xlane.f32.xlu1 %v411_v23 }
 0x406   :  { %431 = vrot.lane.b32.xlu1 %v319_v2, %s775_s28 }
 0x480   :  { %v410_v24 = vpop.xlane.xlu0 %409 }
 0x481   :  { %v414_v25 = vsub.f32 %v406_v17, %v410_v24 }
 0x482   :  { %v413_v26 = vpop.xlane.xlu1 %412 }
 0x483   :  { %v416_v27 = vmul.f32 1.442695, %v414_v25  ;;  %v415_v28 = vsub.f32 %v407_v21, %v413_v26 }
 0x485   :  { %617 = vpow2.f32 %v416_v27  ;;  %v418_v29 = vmul.f32 1.442695, %v415_v28 }
 0x486   :  { %v432_v30 = vpop.permute.xlu1 %431 }
 0x487   :  { %619 = vpow2.f32 %v418_v29  ;;  %569 = vmatpush3.bf16.msra.mxu0 %v432_v30 }
 0x488   :  { %570 = vmatprep.subr.bf16.mxu0 %v773_v12 }
 0x48f   :  { %v618_v31 = vpop.eup %617 }
 0x490   :  { %v420_v32 = vsel %vm106_vm0, %v618_v31, 0.0 }
 0x491   :  { %v620_v33 = vpop.eup %619  ;;  %421 = vadd.xlane.f32.xlu0 %v420_v32 }
 0x492   :  { %v423_v34 = vsel %vm106_vm0, %v620_v33, 0.0 }
 0x495   :  { %424 = vadd.xlane.f32.xlu0 %v423_v34 }
 0x4ab   :  { %433 = vrot.lane.b32.xlu0 %v320_v7, %s775_s28 }
 0x51e   :  { %v422_v35 = vpop.xlane.xlu0 %421 }
 0x51f   :  { %621 = vrcp.f32 %v422_v35 }
 0x522   :  { %v425_v36 = vpop.xlane.xlu0 %424 }
 0x523   :  { %623 = vrcp.f32 %v425_v36 }
 0x526   :  { %v434_v37 = vpop.permute.xlu0 %433 }
 0x527   :  { %571 = vmatpush3.bf16.msra.mxu0 %v434_v37 }
 0x529   :  { %v622_v38 = vpop.eup %621 }
 0x52a   :  { %v428_v40 = vmul.f32 %v622_v38, %v618_v31 }
 0x52d   :  { %v624_v39 = vpop.eup %623 }
 0x52e   :  { %v429_v12 = vmul.f32 %v624_v39, %v620_v33 }
 0x530   :  { %v430_v41 = vpack.c.bf16 %v429_v12, %v428_v40 }
 0x532   :  { %573 = vmatmul.mubr.msk.bf16.vlgmr.msra.gmra.mrb[8].mxu0 %vm106_vm0, %v430_v41 }
 0x605   :  { %v474_v42 = vpop.f32.mrb[8].mxu0 }
 0x606   :  { %481 = vst.msk [vmem:[#allocation11] sm:$0xff] %vm106_vm0, %v474_v42  ;;  %v574_v43 = vpop.f32.mrb[9].mxu0 }
 0x607   :  { %v477_v44 = vpop.f32.mrb[10].mxu0 }
 0x608   :  { %482 = vst.msk [vmem:[#allocation11 + $0x8] sm:$0xff] %vm106_vm0, %v477_v44  ;;  %v575_v45 = vpop.f32.mrb[11].mxu0 }
 0x609   :  { %746 = shalt.err (!%p743_p2)
}
 0x60a   :  { %s747_s10 = scalar_lea.hbm %s962_s5, 256 }
 0x60b   :  { %p748_p3 = scmp.ne.s32.totalorder %s962_s5, %s747_s10  ;;  %p751_p4 = scmp.lt.u32.totalorder %s747_s10, %s962_s5 }
 0x60d   :  { %p753_p5 = pnand %p751_p4, %p748_p3 }
 0x60f   :  { %756 = shalt.err (!%p753_p5)
}
 0x610   :  { %494 = dma.vmem_to_hbm [thread:$0]  %s489_s21, 256, %s962_s5, [#allocation4], %s767_s30, %s767_s30, %s768_s6  }
 0x611   :  { %763 = dma.done.wait [#allocation4], 256  }
 0x612   :  { %764 = vsyncadd [#allocation4], 4294967040 }
 0x613   :  { %498 = vsyncpa [#allocation3], 1 }
 0x614   :  { %499 = vsyncpa [#allocation6], 1 }
 0x615   :  { %500 = vsyncpa [#allocation9], 1 }
 0x616   :  { %501 = vsyncpa [#allocation4], 1 }

</bundles_post_ra>
